<compile_context>
chip_gen: v6e
topology: v6e:2x2x1
jax: 0.10.0
libtpu: 0.0.40
codegen_flags: <defaults>
</compile_context>

<pallas_src>
import functools

import jax
import jax.numpy as jnp
import jax.scipy.linalg as jsl
from jax.experimental import pallas as pl
from jax.experimental.pallas import tpu as pltpu

_EPS = 1e-5


# ----------------------------------------------------------------------------
# shared helper
# ----------------------------------------------------------------------------
def _multiway_layernorm(y, mavg, gamma, beta, *, eps=_EPS):
    """Per-channel (segmented) LayerNorm, fully vectorized.

    `mavg` is a block-diagonal channel-averaging matrix held in compute dtype;
    the two moment matmuls run on the MXU in compute dtype with f32
    accumulation, all other statistics math stays in f32.
    """
    cdt = mavg.dtype
    mu = jnp.dot(y.astype(cdt), mavg, preferred_element_type=jnp.float32)
    yc = y.astype(jnp.float32) - mu
    var = jnp.dot((yc * yc).astype(cdt), mavg,
                  preferred_element_type=jnp.float32)
    return yc * jax.lax.rsqrt(var + eps) * gamma + beta


# ----------------------------------------------------------------------------
# kernel A: LN1 + fused QKV projection (one (T,E)@(E,3E) matmul)
# ----------------------------------------------------------------------------
def _ln_qkv_kernel(x_ref, mavg_ref, g1_ref, b1_ref, wqkv_ref, bqkv_ref,
                   qkv_ref):
    h = _multiway_layernorm(x_ref[0], mavg_ref[...], g1_ref[...], b1_ref[...])
    qkv = jnp.dot(h.astype(wqkv_ref.dtype), wqkv_ref[...],
                  preferred_element_type=jnp.float32) + bqkv_ref[...]
    qkv_ref[0] = qkv.astype(qkv_ref.dtype)


# ----------------------------------------------------------------------------
# kernel B: flash attention with online softmax over kv tiles
# ----------------------------------------------------------------------------
def _flash_attn_kernel(q_ref, k_ref, v_ref, o_ref, m_scr, l_scr, acc_scr,
                       *, approx_recip):
    ik = pl.program_id(2)
    nk = pl.num_programs(2)

    @pl.when(ik == 0)
    def _init():
        m_scr[...] = jnp.full(m_scr.shape, -jnp.inf, dtype=m_scr.dtype)
        l_scr[...] = jnp.zeros(l_scr.shape, dtype=l_scr.dtype)
        acc_scr[...] = jnp.zeros(acc_scr.shape, dtype=acc_scr.dtype)

    q = q_ref[0]                                    # (H, TQ, dh) compute dtype
    k = k_ref[0]                                    # (H, TK, dh)
    v = v_ref[0]
    s = jnp.einsum("hqd,hkd->hqk", q, k,
                   preferred_element_type=jnp.float32)   # (H, TQ, TK) f32

    m_prev = m_scr[...]
    m_new = jnp.maximum(m_prev, s.max(axis=-1, keepdims=True))
    alpha = jnp.exp(m_prev - m_new)
    # TODO(synk): on v6e/v7x (bf16 EUP) the exp could run in bf16 once the
    #             kernel is EUP-bound; kept f32 for v5e compatibility.
    p = jnp.exp(s - m_new)
    l_scr[...] = alpha * l_scr[...] + p.sum(axis=-1, keepdims=True)
    acc_scr[...] = alpha * acc_scr[...] + jnp.einsum(
        "hqk,hkd->hqd", p.astype(v.dtype), v,
        preferred_element_type=jnp.float32)
    m_scr[...] = m_new

    @pl.when(ik == nk - 1)
    def _finalize():
        inv_l = pl.reciprocal(l_scr[...], approx=approx_recip)
        o_ref[0] = (acc_scr[...] * inv_l).astype(o_ref.dtype)


# ----------------------------------------------------------------------------
# kernel C: attention out-projection + residual + LN2 + FFN + residual
# ----------------------------------------------------------------------------
def _out_ffn_kernel(x_ref, ctx_ref, wo_ref, bo_ref, mavg_ref, g2_ref,
                    beta2_ref, w1_ref, b1_ref, w2_ref, b2_ref, o_ref,
                    *, num_channels, ffn_channel_batched):
    cdt = wo_ref.dtype
    # Output projection: single full-width (T,E)@(E,E) matmul (heads merged
    # wrapper-side), no per-head K=dh matmuls and no H-way VPU reduction.
    attn = jnp.dot(ctx_ref[0], wo_ref[...],
                   preferred_element_type=jnp.float32) + bo_ref[...]
    # attention dropout: identity (eval)
    x1 = x_ref[0].astype(jnp.float32) + attn        # residual 1 (f32)

    h2 = _multiway_layernorm(x1, mavg_ref[...], g2_ref[...], beta2_ref[...])

    if ffn_channel_batched:
        # dpc >= 128: channel-batched matmuls on the original per-channel
        # weights (no block-diagonal FLOP / VMEM waste).
        T, E = x1.shape
        dpc = E // num_channels
        h2c = jnp.transpose(h2.reshape(T, num_channels, dpc), (1, 0, 2))
        z = jnp.einsum("ctd,cdf->ctf", h2c.astype(cdt), w1_ref[...],
                       preferred_element_type=jnp.float32) + b1_ref[...]
        z = jax.nn.gelu(z, approximate=True)
        # ffn dropout: identity (eval)
        f = jnp.einsum("ctf,cfd->ctd", z.astype(cdt), w2_ref[...],
                       preferred_element_type=jnp.float32) + b2_ref[...]
        f = jnp.transpose(f, (1, 0, 2)).reshape(T, E)
    else:
        # dpc < 128: block-diagonal weights keep the matmuls full-lane-width.
        z = jnp.dot(h2.astype(cdt), w1_ref[...],
                    preferred_element_type=jnp.float32) + b1_ref[...]
        z = jax.nn.gelu(z, approximate=True)
        # ffn dropout: identity (eval)
        f = jnp.dot(z.astype(cdt), w2_ref[...],
                    preferred_element_type=jnp.float32) + b2_ref[...]

    o_ref[0] = (x1 + f).astype(o_ref.dtype)         # residual 2


# ----------------------------------------------------------------------------
# wrapper: weight re-layout + three pallas_calls
# ----------------------------------------------------------------------------
def _const_spec(shape):
    zeros = (0,) * len(shape)
    # Constant block index: fetched once; Pallas skips re-DMA across steps.
    # TODO(synk): on v7x add pipeline_mode=pl.Buffered(1) to single-buffer.
    return pl.BlockSpec(shape, lambda *_, _z=zeros: _z)


def _nbytes(*arrays):
    return int(sum(a.size * a.dtype.itemsize for a in arrays))


def _vmem_limit(nbytes):
    # Generous headroom over the working set, floored at the default 32 MiB.
    # (Lower the cap towards 64 MiB when targeting v7x at large shapes.)
    return int(min(max(32 << 20, 2 * nbytes), 96 << 20))


def encoder_layer(x, params, *, num_channels, num_heads,
                  compute_dtype=jnp.bfloat16, approx_recip=None,
                  seq_block=256, q_block=256, kv_block=256):
    B, S, E = x.shape
    C, H = num_channels, num_heads
    assert E % C == 0 and E % H == 0
    dpc, dh = E // C, E // H
    F = params["w1"].shape[-1]

    cdt = jnp.dtype(compute_dtype)
    f32 = jnp.float32
    if approx_recip is None:
        approx_recip = cdt != jnp.dtype(jnp.float32)

    T = min(seq_block, S)
    TQ = min(q_block, S)
    TK = min(kv_block, S)
    assert S % T == 0 and S % TQ == 0 and S % TK == 0, \
        "sequence length must divide the tile sizes"

    # ------------- one-time wrapper-side weight re-layout (plain JAX) -------
    ch = jnp.arange(E) // dpc
    mavg = ((ch[:, None] == ch[None, :]).astype(f32) / dpc).astype(cdt)  # (E,E)

    ln1_g = params["ln1_g"].reshape(1, E).astype(f32)
    ln1_b = params["ln1_b"].reshape(1, E).astype(f32)
    ln2_g = params["ln2_g"].reshape(1, E).astype(f32)
    ln2_b = params["ln2_b"].reshape(1, E).astype(f32)

    scale = 1.0 / (dh ** 0.5)
    # Fold the 1/sqrt(dh) query scale into Wq/bq; fuse Q/K/V into one matmul.
    wqkv = jnp.concatenate(
        [(params["wq"] * scale).astype(cdt),
         params["wk"].astype(cdt),
         params["wv"].astype(cdt)], axis=1)                       # (E, 3E)
    bqkv = jnp.concatenate(
        [params["bq"] * scale, params["bk"], params["bv"]],
        axis=-1).reshape(1, 3 * E).astype(f32)

    wo = params["wo"].astype(cdt)                                 # (E, E)
    bo = params["bo"].reshape(1, E).astype(f32)

    ffn_channel_batched = (dpc % 128 == 0) and (C > 1)
    if ffn_channel_batched:
        w1 = params["w1"].astype(cdt)                             # (C, dpc, F)
        b1 = params["b1"].reshape(C, 1, F).astype(f32)
        w2 = params["w2"].astype(cdt)                             # (C, F, dpc)
        b2 = params["b2"].reshape(C, 1, dpc).astype(f32)
    else:
        w1 = jsl.block_diag(*[params["w1"][c] for c in range(C)]).astype(cdt)
        b1 = params["b1"].reshape(1, C * F).astype(f32)
        w2 = jsl.block_diag(*[params["w2"][c] for c in range(C)]).astype(cdt)
        b2 = params["b2"].reshape(1, E).astype(f32)

    # Activations streamed in compute dtype (halves HBM traffic vs. f32).
    x_c = x.astype(cdt)
    cb = cdt.itemsize

    # ------------------------- kernel A: LN1 + fused QKV projection ---------
    consts_a = (mavg, ln1_g, ln1_b, wqkv, bqkv)
    qkv = pl.pallas_call(
        _ln_qkv_kernel,
        out_shape=jax.ShapeDtypeStruct((B, S, 3 * E), cdt),
        grid=(B, S // T),
        in_specs=[pl.BlockSpec((1, T, E), lambda b, i: (b, i, 0))]
                 + [_const_spec(c.shape) for c in consts_a],
        out_specs=pl.BlockSpec((1, T, 3 * E), lambda b, i: (b, i, 0)),
        compiler_params=pltpu.CompilerParams(
            dimension_semantics=("parallel", "parallel"),
            vmem_limit_bytes=_vmem_limit(
                _nbytes(*consts_a) + 2 * 4 * T * E * cb)),
        cost_estimate=pl.CostEstimate(
            flops=int(10 * B * S * E * E),
            transcendentals=int(B * S * E),
            bytes_accessed=int(4 * B * S * E * cb + _nbytes(*consts_a))),
    )(x_c, *consts_a)

    # Head split: cheap wrapper-side layout plumbing (no in-kernel relayouts).
    q, k, v = jnp.split(qkv, 3, axis=-1)

    def split_heads(t):                                 # (B,S,E) -> (B,H,S,dh)
        return t.reshape(B, S, H, dh).transpose(0, 2, 1, 3)

    q, k, v = split_heads(q), split_heads(k), split_heads(v)

    # ------------------------- kernel B: flash attention --------------------
    flash = functools.partial(_flash_attn_kernel,
                              approx_recip=bool(approx_recip))
    ctx = pl.pallas_call(
        flash,
        out_shape=jax.ShapeDtypeStruct((B, H, S, dh), cdt),
        grid=(B, S // TQ, S // TK),
        in_specs=[
            pl.BlockSpec((1, H, TQ, dh), lambda b, iq, ik: (b, 0, iq, 0)),
            pl.BlockSpec((1, H, TK, dh), lambda b, iq, ik: (b, 0, ik, 0)),
            pl.BlockSpec((1, H, TK, dh), lambda b, iq, ik: (b, 0, ik, 0)),
        ],
        out_specs=pl.BlockSpec((1, H, TQ, dh), lambda b, iq, ik: (b, 0, iq, 0)),
        scratch_shapes=[
            pltpu.VMEM((H, TQ, 1), f32),    # running max
            pltpu.VMEM((H, TQ, 1), f32),    # running denominator
            pltpu.VMEM((H, TQ, dh), f32),   # context accumulator
        ],
        compiler_params=pltpu.CompilerParams(
            dimension_semantics=("parallel", "parallel", "arbitrary"),
            vmem_limit_bytes=_vmem_limit(
                2 * (2 * H * TQ * dh + 2 * H * TK * dh) * cb
                + H * TQ * (dh + 2 * 128) * 4)),
        cost_estimate=pl.CostEstimate(
            flops=int(4 * B * S * S * E),
            transcendentals=int(B * H * S * S),
            bytes_accessed=int((2 + 2 * (S // TQ)) * B * S * E * cb)),
    )(q, k, v)

    # Head merge: (B,H,S,dh) -> (B,S,E), again wrapper-side layout plumbing.
    ctx = ctx.transpose(0, 2, 1, 3).reshape(B, S, E)

    # --------------- kernel C: out-proj + residual + LN2 + FFN + residual ---
    consts_c = (wo, bo, mavg, ln2_g, ln2_b, w1, b1, w2, b2)
    out_ffn = functools.partial(
        _out_ffn_kernel, num_channels=C,
        ffn_channel_batched=bool(ffn_channel_batched))
    out = pl.pallas_call(
        out_ffn,
        out_shape=jax.ShapeDtypeStruct((B, S, E), jnp.float32),
        grid=(B, S // T),
        in_specs=[pl.BlockSpec((1, T, E), lambda b, i: (b, i, 0)),
                  pl.BlockSpec((1, T, E), lambda b, i: (b, i, 0))]
                 + [_const_spec(c.shape) for c in consts_c],
        out_specs=pl.BlockSpec((1, T, E), lambda b, i: (b, i, 0)),
        compiler_params=pltpu.CompilerParams(
            dimension_semantics=("parallel", "parallel"),
            vmem_limit_bytes=_vmem_limit(
                _nbytes(*consts_c) + 2 * T * E * (2 * cb + 4))),
        cost_estimate=pl.CostEstimate(
            flops=int(6 * B * S * E * E + 2 * B * S * (w1.size + w2.size)),
            transcendentals=int(B * S * (C * F + E)),
            bytes_accessed=int(2 * B * S * E * cb + 4 * B * S * E
                               + _nbytes(*consts_c))),
    )(x_c, ctx, *consts_c)

    return out


# ----------------------------------------------------------------------------
# pure-JAX reference (same math) for correctness checks
# ----------------------------------------------------------------------------
def encoder_layer_ref(x, p, *, num_channels, num_heads):
    B, S, E = x.shape
    dpc = E // num_channels
    dh = E // num_heads
    eps = _EPS

    def mw_ln(y, g, b):
        y3 = y.reshape(B, S, num_channels, dpc)
        mu = y3.mean(-1, keepdims=True)
        var = ((y3 - mu) ** 2).mean(-1, keepdims=True)
        yn = (y3 - mu) / jnp.sqrt(var + eps) * g + b
        return yn.reshape(B, S, E)

    h = mw_ln(x, p["ln1_g"], p["ln1_b"])
    q = h @ p["wq"] + p["bq"]
    k = h @ p["wk"] + p["bk"]
    v = h @ p["wv"] + p["bv"]
    q = q.reshape(B, S, num_heads, dh).transpose(0, 2, 1, 3) / (dh ** 0.5)
    k = k.reshape(B, S, num_heads, dh).transpose(0, 2, 1, 3)
    v = v.reshape(B, S, num_heads, dh).transpose(0, 2, 1, 3)
    s = jnp.einsum("bhqd,bhkd->bhqk", q, k)
    a = jax.nn.softmax(s, axis=-1)
    o = jnp.einsum("bhqk,bhkd->bhqd", a, v).transpose(0, 2, 1, 3).reshape(B, S, E)
    o = o @ p["wo"] + p["bo"]
    x = x + o

    h2 = mw_ln(x, p["ln2_g"], p["ln2_b"]).reshape(B, S, num_channels, dpc)
    z = jnp.einsum("bscd,cdf->bscf", h2, p["w1"]) + p["b1"]
    z = jax.nn.gelu(z, approximate=True)
    f = jnp.einsum("bscf,cfd->bscd", z, p["w2"]) + p["b2"]
    return x + f.reshape(B, S, E)


# ----------------------------------------------------------------------------
if __name__ == "__main__":
    B, S = 2, 8
    num_channels = 4
    embed_dim = 32
    num_heads = 4
    ffn_dim = 64
    dpc = embed_dim // num_channels

    key = jax.random.PRNGKey(0)
    ks = jax.random.split(key, 16)

    def init(k, shape, scale=0.05):
        return (scale * jax.random.normal(k, shape)).astype(jnp.float32)

    params = {
        # MultiwayNetwork(LayerNorm(dpc)) -> per-channel gamma/beta
        "ln1_g": jnp.ones((num_channels, dpc), jnp.float32),
        "ln1_b": jnp.zeros((num_channels, dpc), jnp.float32),
        "ln2_g": jnp.ones((num_channels, dpc), jnp.float32),
        "ln2_b": jnp.zeros((num_channels, dpc), jnp.float32),
        # MultiheadAttention(embed_dim, num_heads) projections (x @ W layout)
        "wq": init(ks[0], (embed_dim, embed_dim)), "bq": init(ks[1], (1, embed_dim)),
        "wk": init(ks[2], (embed_dim, embed_dim)), "bk": init(ks[3], (1, embed_dim)),
        "wv": init(ks[4], (embed_dim, embed_dim)), "bv": init(ks[5], (1, embed_dim)),
        "wo": init(ks[6], (embed_dim, embed_dim)), "bo": init(ks[7], (1, embed_dim)),
        # MultiwayNetwork(FeedForwardNetwork(dpc, ffn_dim)) -> per-channel FFN
        "w1": init(ks[8], (num_channels, dpc, ffn_dim)),
        "b1": init(ks[9], (num_channels, ffn_dim)),
        "w2": init(ks[10], (num_channels, ffn_dim, dpc)),
        "b2": init(ks[11], (num_channels, dpc)),
    }

    x = jax.random.normal(ks[12], (B, S, embed_dim), jnp.float32)

    ref = encoder_layer_ref(x, params, num_channels=num_channels,
                            num_heads=num_heads)

    # f32 compute path: must match the reference tightly.
    out_f32 = encoder_layer(x, params, num_channels=num_channels,
                            num_heads=num_heads, compute_dtype=jnp.float32)
    out_f32 = jax.block_until_ready(out_f32)
    assert out_f32.shape == (B, S, embed_dim)
    assert jnp.allclose(out_f32, ref, rtol=1e-4, atol=1e-4), \
        "f32 mismatch vs reference"

    # bf16 matmul path (production mode): f32 accumulation, looser tolerance.
    out_bf16 = encoder_layer(x, params, num_channels=num_channels,
                             num_heads=num_heads, compute_dtype=jnp.bfloat16)
    out_bf16 = jax.block_until_ready(out_bf16)
    assert jnp.allclose(out_bf16, ref, rtol=2e-2, atol=2e-2), \
        "bf16 mismatch vs reference"

    print("KERNEL_OK")
</pallas_src>

<mosaic_0001>
module attributes {stable_mosaic.version = 11 : i64} {
  func.func @_ln_qkv_kernel(%arg0: i32, %arg1: i32, %arg2: memref<1x8x32xf32, #tpu.memory_space<vmem>>, %arg3: memref<32x32xf32, #tpu.memory_space<vmem>>, %arg4: memref<1x32xf32, #tpu.memory_space<vmem>>, %arg5: memref<1x32xf32, #tpu.memory_space<vmem>>, %arg6: memref<32x96xf32, #tpu.memory_space<vmem>>, %arg7: memref<1x96xf32, #tpu.memory_space<vmem>>, %arg8: memref<1x8x96xf32, #tpu.memory_space<vmem>>) attributes {dimension_semantics = [#tpu.dimension_semantics<parallel>, #tpu.dimension_semantics<parallel>], iteration_bounds = array<i64: 2, 1>, scalar_prefetch = 0 : i64, scratch_operands = 0 : i64, tpu.core_type = #tpu.core_type<tc>, window_params = [{transform_indices = @transform_0, window_bounds = array<i64: 1, 8, 32>}, {pipeline_mode = #tpu.pipeline_mode<synchronous>, transform_indices = @transform_1, window_bounds = array<i64: 32, 32>}, {pipeline_mode = #tpu.pipeline_mode<synchronous>, transform_indices = @transform_2, window_bounds = array<i64: 1, 32>}, {pipeline_mode = #tpu.pipeline_mode<synchronous>, transform_indices = @transform_3, window_bounds = array<i64: 1, 32>}, {pipeline_mode = #tpu.pipeline_mode<synchronous>, transform_indices = @transform_4, window_bounds = array<i64: 32, 96>}, {pipeline_mode = #tpu.pipeline_mode<synchronous>, transform_indices = @transform_5, window_bounds = array<i64: 1, 96>}, {transform_indices = @transform_6, window_bounds = array<i64: 1, 8, 96>}]} {
    %c0 = arith.constant 0 : index
    %c0_0 = arith.constant 0 : index
    %c0_1 = arith.constant 0 : index
    %0 = vector.load %arg2[%c0, %c0_0, %c0_1] : memref<1x8x32xf32, #tpu.memory_space<vmem>>, vector<1x8x32xf32>
    %1 = vector.shape_cast %0 : vector<1x8x32xf32> to vector<8x32xf32>
    %c0_2 = arith.constant 0 : index
    %c0_3 = arith.constant 0 : index
    %2 = vector.load %arg3[%c0_2, %c0_3] : memref<32x32xf32, #tpu.memory_space<vmem>>, vector<32x32xf32>
    %c0_4 = arith.constant 0 : index
    %c0_5 = arith.constant 0 : index
    %3 = vector.load %arg4[%c0_4, %c0_5] : memref<1x32xf32, #tpu.memory_space<vmem>>, vector<1x32xf32>
    %c0_6 = arith.constant 0 : index
    %c0_7 = arith.constant 0 : index
    %4 = vector.load %arg5[%c0_6, %c0_7] : memref<1x32xf32, #tpu.memory_space<vmem>>, vector<1x32xf32>
    %cst = arith.constant dense<0.000000e+00> : vector<8x32xf32>
    %5 = tpu.matmul %1, %2, %cst {dimension_numbers = #tpu.dot_dimension_numbers<[1], [0], [0], [1], [0, 0, 1, 1], [], []>} : vector<8x32xf32>, vector<32x32xf32>, vector<8x32xf32> -> vector<8x32xf32>
    %6 = arith.subf %1, %5 : vector<8x32xf32>
    %7 = arith.mulf %6, %6 : vector<8x32xf32>
    %cst_8 = arith.constant dense<0.000000e+00> : vector<8x32xf32>
    %8 = tpu.matmul %7, %2, %cst_8 {dimension_numbers = #tpu.dot_dimension_numbers<[1], [0], [0], [1], [0, 0, 1, 1], [], []>} : vector<8x32xf32>, vector<32x32xf32>, vector<8x32xf32> -> vector<8x32xf32>
    %cst_9 = arith.constant 9.99999974E-6 : f32
    %9 = vector.broadcast %cst_9 : f32 to vector<8x32xf32>
    %10 = arith.addf %8, %9 : vector<8x32xf32>
    %11 = math.rsqrt %10 : vector<8x32xf32>
    %12 = arith.mulf %6, %11 : vector<8x32xf32>
    %13 = vector.broadcast %3 : vector<1x32xf32> to vector<8x32xf32>
    %14 = arith.mulf %12, %13 : vector<8x32xf32>
    %15 = vector.broadcast %4 : vector<1x32xf32> to vector<8x32xf32>
    %16 = arith.addf %14, %15 : vector<8x32xf32>
    %c0_10 = arith.constant 0 : index
    %c0_11 = arith.constant 0 : index
    %17 = vector.load %arg6[%c0_10, %c0_11] : memref<32x96xf32, #tpu.memory_space<vmem>>, vector<32x96xf32>
    %cst_12 = arith.constant dense<0.000000e+00> : vector<8x96xf32>
    %18 = tpu.matmul %16, %17, %cst_12 {dimension_numbers = #tpu.dot_dimension_numbers<[1], [0], [0], [1], [0, 0, 1, 1], [], []>} : vector<8x32xf32>, vector<32x96xf32>, vector<8x96xf32> -> vector<8x96xf32>
    %c0_13 = arith.constant 0 : index
    %c0_14 = arith.constant 0 : index
    %19 = vector.load %arg7[%c0_13, %c0_14] : memref<1x96xf32, #tpu.memory_space<vmem>>, vector<1x96xf32>
    %20 = vector.broadcast %19 : vector<1x96xf32> to vector<8x96xf32>
    %21 = arith.addf %18, %20 : vector<8x96xf32>
    %c0_15 = arith.constant 0 : index
    %c0_16 = arith.constant 0 : index
    %c0_17 = arith.constant 0 : index
    %22 = vector.load %arg8[%c0_15, %c0_16, %c0_17] : memref<1x8x96xf32, #tpu.memory_space<vmem>>, vector<1x8x96xf32>
    %23 = vector.shape_cast %22 : vector<1x8x96xf32> to vector<8x96xf32>
    %24 = vector.shape_cast %21 : vector<8x96xf32> to vector<1x8x96xf32>
    tpu.vector_store %arg8[%c0_15, %c0_16, %c0_17], %24 {strides = array<i32>} : memref<1x8x96xf32, #tpu.memory_space<vmem>>, vector<1x8x96xf32>,
    return
  }
  func.func @transform_0(%arg0: i32, %arg1: i32) -> (i32, i32, i32) {
    %c0_i32 = arith.constant 0 : i32
    %c0_i32_0 = arith.constant 0 : i32
    return %arg0, %arg1, %c0_i32 : i32, i32, i32
  }
  func.func @transform_1(%arg0: i32, %arg1: i32) -> (i32, i32) {
    %c0_i32 = arith.constant 0 : i32
    %c0_i32_0 = arith.constant 0 : i32
    %c0_i32_1 = arith.constant 0 : i32
    return %c0_i32, %c0_i32_0 : i32, i32
  }
  func.func @transform_2(%arg0: i32, %arg1: i32) -> (i32, i32) {
    %c0_i32 = arith.constant 0 : i32
    %c0_i32_0 = arith.constant 0 : i32
    %c0_i32_1 = arith.constant 0 : i32
    return %c0_i32, %c0_i32_0 : i32, i32
  }
  func.func @transform_3(%arg0: i32, %arg1: i32) -> (i32, i32) {
    %c0_i32 = arith.constant 0 : i32
    %c0_i32_0 = arith.constant 0 : i32
    %c0_i32_1 = arith.constant 0 : i32
    return %c0_i32, %c0_i32_0 : i32, i32
  }
  func.func @transform_4(%arg0: i32, %arg1: i32) -> (i32, i32) {
    %c0_i32 = arith.constant 0 : i32
    %c0_i32_0 = arith.constant 0 : i32
    %c0_i32_1 = arith.constant 0 : i32
    return %c0_i32, %c0_i32_0 : i32, i32
  }
  func.func @transform_5(%arg0: i32, %arg1: i32) -> (i32, i32) {
    %c0_i32 = arith.constant 0 : i32
    %c0_i32_0 = arith.constant 0 : i32
    %c0_i32_1 = arith.constant 0 : i32
    return %c0_i32, %c0_i32_0 : i32, i32
  }
  func.func @transform_6(%arg0: i32, %arg1: i32) -> (i32, i32, i32) {
    %c0_i32 = arith.constant 0 : i32
    %c0_i32_0 = arith.constant 0 : i32
    return %arg0, %arg1, %c0_i32 : i32, i32, i32
  }
}

</mosaic_0001>

<bundles_post_ra>
// kernel: tpu_custom_call.1
= control target key start
LH: loop header
LB: loop body
LE: loop exit
PB: predicated region body
PF: predicated region fallthrough
CT: control target
= control target key end

     0   :  { %s1253_s0 = inlined_call_operand.hbm [shape: f32[2,8,32], index: 0, kind: input, shape index: {}]   ;;  %s1254_s1 = inlined_call_operand.hbm [shape: f32[32,32], index: 1, kind: input, shape index: {}]   ;;  %s1255_s2 = inlined_call_operand.vmem [shape: f32[1,32], index: 2, kind: input, shape index: {}]   ;;  %s1256_s3 = inlined_call_operand.vmem [shape: f32[1,32], index: 3, kind: input, shape index: {}]   ;;  %s1257_s4 = inlined_call_operand.hbm [shape: f32[32,96], index: 4, kind: input, shape index: {}]   ;;  %s1258_s5 = inlined_call_operand.vmem [shape: f32[1,96], index: 5, kind: input, shape index: {}]   ;;  %s1259_s6 = inlined_call_operand.hbm [shape: f32[2,8,96], index: 6, kind: output, shape index: {}]  }
   0x1   :  { %1263 = sst [smem:[#allocation12_spill]] %s1254_s1 }
   0x2   :  { %1264 = sst [smem:[#allocation13_spill]] %s1257_s4 }
   0x3   :  { %11 = vsyncpa [#allocation3], 0 }
   0x4   :  { %13 = vsyncpa [#allocation3 + $0x1], 0 }
   0x5   :  { %14 = vsyncpa [#allocation6], 0 }
   0x6   :  { %15 = vsyncpa [#allocation4], 0 }
   0x7   :  { %17 = vsyncpa [#allocation4 + $0x1], 0  ;;  %s1054_s21 = smov 0   ;;  %s1056_s22 = smov 0  }
   0x8   :  { %s1058_s23 = smov 0   ;;  %s1060_s24 = smov 0  }
   0x9   :  { %s1062_s25 = smov 0   ;;  %s1064_s26 = smov 0  }
   0xa LB: > { %s685_s27 = sadd.s32 4294967295, %s1009_s26   ;;  %s686_s28 = sadd.s32 4294967294, %s1009_s26   ;;  %s1009_s26 = sphi %s1064_s26, %s23_s26   ;;  %s1005_s25 = sphi %s1062_s25, %s1283_s25   ;;  %s1001_s24 = sphi %s1060_s24, %s1282_s24   ;;  %s997_s23 = sphi %s1058_s23, %s1281_s23   ;;  %s993_s22 = sphi %s1056_s22, %s1280_s22   ;;  %s989_s21 = sphi %s1054_s21, %s1279_s21  }
   0xb   : > { %p57_p0 = scmp.ne.s32.totalorder %s993_s22, %s989_s21  ;;  %p1088_p1 = scmp.eq.s32.totalorder %s685_s27, 0 }
   0xc   : > { %p1092_p2 = scmp.eq.s32.totalorder %s685_s27, 1  ;;  %p194_p3 = scmp.eq.s32.totalorder %s686_s28, 1 }
   0xd   : > { %s1265_s29 = scalar_select %p1088_p1, 1, 0 }
   0xe   : > { %p1098_p4 = por %p1088_p1, %p57_p0  ;;  %p687_p5 = scmp.ge.s32.totalorder %s1009_s26, 1 }
   0xf   : > { %p1103_p6 = por %p194_p3, %p57_p0  ;;  %p201_p7 = scmp.lt.s32.totalorder %s1009_s26, 3 }
  0x10   : > { %s1267_s7 = scalar_select %p1098_p4, 1, 0 }
  0x11   : > { %s1268_s8 = scalar_select %p1103_p6, 1, 0 }
  0x12   : > { %p1108_p8 = pnand %p687_p5, %p201_p7  ;;  %s1011_s10 = smov [#allocation5]  }
  0x13   : > { %s213_s11 = sshll.u32 %s1011_s10, 4  ;;  %s1012_s13 = smov [#allocation7]   ;;  %s214_s11 = int_to_ptr.vmem [resolvable:$true] %s213_s11 }
  0x14   : > { %p768_p9 = pneg %p1108_p8  ;;  %s232_s14 = sshll.u32 %s1012_s13, 4  ;;  %s233_s14 = int_to_ptr.vmem [resolvable:$true] %s232_s14 }
  0x15   : > { %s856_s15 = scalar_lea.vmem %s214_s11, 512  ;;  %p864_p5 = scmp.lt.s32.totalorder %s214_s11, %s214_s11 }
  0x16   : > { %p1117_p11 = pnand %p768_p9, %p1088_p1  ;;  %p857_p13 = scmp.ne.s32.totalorder %s214_s11, %s856_s15 }
  0x17   : > { %p865_p7 = scmp.lt.s32.totalorder %s856_s15, %s856_s15 }
  0x18   : > { %p847_p12 = pneg %p1117_p11 }
  0x19   : > { %p866_p10 = por %p865_p7, %p864_p5 }
  0x1a   : > { %p859_p0 = pnand %p857_p13, %p847_p12 }
  0x1c   : > { %p860_p3 = pneg %p859_p0 }
  0x1e   : > { %p867_p9 = pnand %p866_p10, %p860_p3 }
  0x20   : > { %870 = shalt.err (!%p867_p9)
}
  0x21   : > { %s1013_s16 = smov 128   ;;  %s1014_s17 = smov 8  }
  0x22   : > { %s1271_s1 = sld [smem:[#allocation12_spill]]  ;;  %s882_s20 = scalar_lea.vmem %s233_s14, 512 }
  0x23   : > { %p883_p6 = scmp.ne.s32.totalorder %s233_s14, %s882_s20  ;;  %p890_p1 = scmp.lt.s32.totalorder %s233_s14, %s233_s14 }
  0x24   : > { %p891_p4 = scmp.lt.s32.totalorder %s882_s20, %s882_s20 }
  0x25   : > { %p885_p13 = pnand %p883_p6, %p847_p12 }
  0x26   : > { %p892_p5 = por %p891_p4, %p890_p1 }
  0x27   : > { %p886_p0 = pneg %p885_p13 }
  0x28   : > { %771 = dma.hbm_to_vmem [thread:$0]  (!%p1117_p11), %s1271_s1, 512, %s214_s11, [#allocation6], %s1013_s16, %s1013_s16, %s1014_s17  }
  0x29   : > { %p893_p10 = pnand %p892_p5, %p886_p0 }
  0x2b   : > { %896 = shalt.err (!%p893_p10)
}
  0x2c   : > { %s1272_s4 = sld [smem:[#allocation13_spill]]  ;;  %s35_s10 = sadd.s32 1, %s1005_s25 }
  0x2d   : > { %s44_s11 = sadd.s32 1, %s997_s23  ;;  %p37_p1 = scmp.ge.s32.totalorder %s35_s10, 2 }
  0x2e   : > { %p51_p4 = scmp.ne.s32.totalorder %s997_s23, %s993_s22  ;;  %p52_p6 = scmp.eq.s32.totalorder %s1009_s26, 0 }
  0x2f   : > { %p785_p12 = scmp.lt.s32.totalorder %s1009_s26, 2  ;;  %s1285_s10 = smov (%p37_p1, %s35_s10), 0 }
  0x30   : > { %p53_p3 = por %p52_p6, %p51_p4  ;;  %p1149_p7 = por %p1092_p2, %p51_p4 }
  0x31   : > { %s39_s13 = ssub.s32 %s1005_s25, %s1285_s10  ;;  %s249_s15 = sand.u32 1, %s997_s23  }
  0x32   : > { %774 = dma.hbm_to_vmem [thread:$0]  (!%p1117_p11), %s1272_s4, 512, %s233_s14, [#allocation6], %s1013_s16, %s1013_s16, %s1014_s17  }
  0x33   : > { %p42_p9 = scmp.eq.s32.totalorder %s39_s13, 0  ;;  %s691_s14 = sshll.u32 %s249_s15, 3 }
  0x34   : > { %s692_s16 = sshll.u32 %s1005_s25, 7  ;;  %s253_s27 = scalar_lea.vmem [#allocation2], %s691_s14 }
  0x35   : > { %s1158_s17 = scalar_select %p42_p9, %s997_s23, %s44_s11  }
  0x36   : > { %s259_s20 = scalar_lea.hbm %s1253_s0, %s692_s16  ;;  %s261_s28 = sshll.u32 %s253_s27, 4  ;;  %s262_s28 = int_to_ptr.vmem [resolvable:$true] %s261_s28 }
  0x37   : > { %p1165_p11 = pnand %p785_p12, %p53_p3  ;;  %s250_s1 = scalar_lea.sflag [#allocation3], %s249_s15 }
  0x38   : > { %s910_s13 = scalar_lea.vmem %s262_s28, 128  ;;  %s1015_s11 = smov [#allocation2]  }
  0x39   : > { %p899_p2 = pneg %p1165_p11  ;;  %p911_p13 = scmp.ne.s32.totalorder %s262_s28, %s910_s13 }
  0x3a   : > { %s915_s4 = sshll.u32 %s1015_s11, 4  ;;  %s916_s4 = int_to_ptr.vmem [resolvable:$false] %s915_s4 }
  0x3b   : > { %p913_p0 = pnand %p911_p13, %p899_p2  ;;  %s917_s16 = scalar_lea.vmem %s916_s4, 256 }
  0x3c   : > { %p918_p10 = scmp.lt.s32.totalorder %s262_s28, %s916_s4  ;;  %p919_p1 = scmp.lt.s32.totalorder %s917_s16, %s910_s13 }
  0x3d   : > { %p914_p5 = pneg %p913_p0 }
  0x3e   : > { %p920_p4 = por %p919_p1, %p918_p10 }
  0x40   : > { %p921_p6 = pnand %p920_p4, %p914_p5 }
  0x42   : > { %924 = shalt.err (!%p921_p6)
}
  0x43   : > { %778 = dma.hbm_to_vmem [thread:$0]  (!%p1165_p11), %s259_s20, 128, %s262_s28, %s250_s1  }
  0x44   : > { %270 = sbr.rel (%p1108_p8) target bundleno = 707 (0x2c3), region = 44  ;;  %s1176_s15 = sand.u32 (!%p1108_p8), 1, %s993_s22  }
  0x45   : > { %s694_s14 = sshll.u32 (!%p1108_p8), %s1176_s15, 3  ;;  %s273_s18 = scalar_lea.sflag (!%p1108_p8), [#allocation3], %s1176_s15 }
  0x46   : > { %s276_s4 = scalar_lea.vmem (!%p1108_p8), [#allocation2], %s694_s14  ;;  %p1275_p12 = scmp.ne.s32.totalorder (!%p1108_p8), %s1267_s7, 0 }
  0x49   : > { %976 = dma.done.wait (%p1275_p12), %s273_s18, 128  }
  0x4a   : > { %978 = vsyncadd (%p1275_p12), %s273_s18, 4294967168  ;;  %p1276_p3 = scmp.ne.s32.totalorder %s1265_s29, 0 }
  0x4c   : > { %980 = dma.done.wait (%p1276_p3), [#allocation6], 1024  }
  0x4d   : > { %982 = vsyncadd (%p1276_p3), [#allocation6], 4294966272  ;;  %v1016_v0 = vmov 0.0   ;;  %vm1017_vm0 = vmmov 0   ;;  %v317_v1 = vld [vmem:[#allocation5 + $0x18] sm:$0xff]  ;;  %v316_v2 = vld [vmem:[#allocation5 + $0x10] sm:$0xff] }
  0x4e   : > { %723 = vmatprep.subr.mxu0 %v1016_v0  ;;  %731 = vmatprep.mubr.msk.f32.mxu0 %vm1017_vm0, %v1016_v0  ;;  %v315_v3 = vld [vmem:[#allocation5 + $0x8] sm:$0xff]  ;;  %v314_v4 = vld [vmem:[#allocation5] sm:$0xff]  ;;  %v313_v5 = vld [vmem:[%s276_s4] sm:$0xff]  ;;  %vm320_vm1 = vcmask 261120   ;;  %s705_s27 = sshll.u32 %s1001_s24, 7  ;;  %s312_s28 = scalar_lea.vmem [#allocation8], %s694_s14 }
  0x4f   : > { %734 = vmatprep.subr.mxu1 %v1016_v0  ;;  %742 = vmatprep.mubr.msk.f32.mxu1 %vm1017_vm0, %v1016_v0  ;;  %v488_v10 = vld [vmem:[#allocation7 + $0x18] sm:$0xff]  ;;  %v487_v11 = vld [vmem:[#allocation7 + $0x10] sm:$0xff]  ;;  %v486_v12 = vld [vmem:[#allocation7 + $0x8] sm:$0xff]  ;;  %s586_s30 = sshll.u32 %s312_s28, 4  ;;  %vm569_vm2 = vcmask 785408   ;;  %s1211_s16 = scalar_lea.hbm %s1259_s6, %s705_s27  ;;  %s587_s30 = int_to_ptr.vmem [resolvable:$true] %s586_s30 }
  0x50   : > { %724 = vmatpush3.msra.mxu0 %v317_v1  ;;  %735 = vmatpush3.msra.mxu1 %v317_v1  ;;  %v485_v13 = vld [vmem:[#allocation7] sm:$0xff]  ;;  %v700_v18 = vld [vmem:[%s1255_s2] ss:$0 sm:$0xff]  ;;  %s572_s18 = scalar_lea.sflag [#allocation4], %s1176_s15  ;;  %s925_s4 = scalar_lea.vmem %s587_s30, 128 }
  0x51   : > { %725 = vmatprep.subr.mxu0 %v1016_v0  ;;  %736 = vmatprep.subr.mxu1 %v1016_v0  ;;  %v701_v20 = vld [vmem:[%s1256_s3] ss:$0 sm:$0xff]  ;;  %p926_p8 = scmp.ne.s32.totalorder %s587_s30, %s925_s4  ;;  %s1018_s24 = smov [#allocation8]  }
  0x52   : > { %726 = vmatpush3.msra.mxu0 %v316_v2  ;;  %737 = vmatpush3.msra.mxu1 %v316_v2  ;;  %v702_v23 = vld [vmem:[%s1258_s5] ss:$0 sm:$0xff]  ;;  %s929_s14 = sshll.u32 %s1018_s24, 4  ;;  %s930_s14 = int_to_ptr.vmem [resolvable:$false] %s929_s14 }
  0x53   : > { %727 = vmatprep.subr.mxu0 %v1016_v0  ;;  %738 = vmatprep.subr.mxu1 %v1016_v0  ;;  %p927_p9 = pnand %p926_p8, %p1149_p7  ;;  %s931_s1 = scalar_lea.vmem %s930_s14, 256 }
  0x54   : > { %728 = vmatpush3.msra.mxu0 %v315_v3  ;;  %739 = vmatpush3.msra.mxu1 %v315_v3  ;;  %p932_p2 = scmp.lt.s32.totalorder %s587_s30, %s930_s14  ;;  %p933_p13 = scmp.lt.s32.totalorder %s931_s1, %s925_s4 }
  0x55   : > { %729 = vmatprep.subr.mxu0 %v1016_v0  ;;  %740 = vmatprep.subr.mxu1 %v1016_v0  ;;  %p928_p11 = pneg %p927_p9 }
  0x56   : > { %730 = vmatpush3.msra.mxu0 %v314_v4  ;;  %741 = vmatpush3.msra.mxu1 %v314_v4  ;;  %p934_p0 = por %p933_p13, %p932_p2 }
  0x57   : > { %732 = vmatmul.mubr.msk.f32.vlgmr.msra.gmra.mxu0 %vm320_vm1, %v313_v5  ;;  %745 = vmatprep.subr.mxu0 %v1016_v0 }
  0x58   : > { %753 = vmatprep.mubr.msk.f32.mxu0 %vm1017_vm0, %v1016_v0  ;;  %746 = vmatpush3.msra.mxu0 %v488_v10  ;;  %p935_p5 = pnand %p934_p0, %p928_p11 }
  0x59   : > { %747 = vmatprep.subr.mxu0 %v1016_v0 }
  0x5a   : > { %748 = vmatpush3.msra.mxu0 %v487_v11 }
  0x5b   : > { %749 = vmatprep.subr.mxu0 %v1016_v0 }
  0x5c   : > { %750 = vmatpush3.msra.mxu0 %v486_v12 }
  0x5d   : > { %751 = vmatprep.subr.mxu0 %v1016_v0 }
  0x5e   : > { %752 = vmatpush3.msra.mxu0 %v485_v13 }
 0x117   : > { %v390_v6 = vpop.f32.mrf.mxu0 }
 0x118   : > { %v394_v7 = vsub.f32 %v313_v5, %v390_v6 }
 0x119   : > { %v733_v8 = vpop.f32.mrf.mxu0 }
 0x11a   : > { %v395_v9 = vmul.f32 %v394_v7, %v394_v7 }
 0x11c   : > { %743 = vmatmul.mubr.msk.f32.vlgmr.msra.gmra.mxu1 %vm320_vm1, %v395_v9 }
 0x1dc   : > { %v465_v14 = vpop.f32.mrf.mxu1 }
 0x1dd   : > { %v466_v15 = vadd.f32 1e-05, %v465_v14 }
 0x1de   : > { %v744_v16 = vpop.f32.mrf.mxu1 }
 0x1df   : > { %843 = vrsqrt.f32 %v466_v15 }
 0x1ec   : > { %v844_v17 = vpop.eup %843 }
 0x1ed   : > { %v470_v19 = vmul.f32 %v844_v17, %v394_v7 }
 0x1ef   : > { %v477_v21 = vmul.f32 %v700_v18, %v470_v19 }
 0x1f1   : > { %v484_v22 = vadd.f32 %v701_v20, %v477_v21 }
 0x1f3   : > { %754 = vmatmul.mubr.msk.f32.vlgmr.msra.gmra.mxu0 %vm320_vm1, %v484_v22 }
 0x2b3   : > { %v565_v24 = vpop.f32.mrf.mxu0 }
 0x2b4   : > { %v566_v25 = vadd.f32 %v702_v23, %v565_v24 }
 0x2b5   : > { %v755_v26 = vpop.f32.mrf.mxu0 }
 0x2b6   : > { %570 = vst.msk [vmem:[%s312_s28] sm:$0xff] %vm569_vm2, %v566_v25 }
 0x2b7   : > { %938 = shalt.err (!%p935_p5)
}
 0x2b8   : > { %s939_s29 = scalar_lea.hbm %s1211_s16, 128  ;;  %s943_s9 = scalar_lea.hbm %s1259_s6, 256 }
 0x2b9   : > { %p940_p10 = scmp.ne.s32.totalorder %s1211_s16, %s939_s29  ;;  %p944_p6 = scmp.lt.s32.totalorder %s1211_s16, %s1259_s6 }
 0x2ba   : > { %p945_p12 = scmp.lt.s32.totalorder %s943_s9, %s939_s29 }
 0x2bb   : > { %p941_p1 = pnand %p940_p10, %p1149_p7 }
 0x2bc   : > { %p946_p3 = por %p945_p12, %p944_p6 }
 0x2bd   : > { %p942_p4 = pneg %p941_p1 }
 0x2bf   : > { %p947_p8 = pnand %p946_p3, %p942_p4 }
 0x2c1   : > { %950 = shalt.err (!%p947_p8)
}
 0x2c2   : > { %766 = dma.vmem_to_hbm [thread:$0]  (%p1149_p7), %s587_s30, 128, %s1211_s16, %s572_s18  }
 0x2c3 PF: > { %s598_s27 = sand.u32 1, %s989_s21   ;;  %p1277_p9 = scmp.ne.s32.totalorder %s1268_s8, 0 }
 0x2c4   : > { %p1278_p11 = scmp.ge.s32.totalorder %s1009_s26, 2  ;;  %s599_s28 = scalar_lea.sflag [#allocation4], %s598_s27 }
 0x2c6   : > { %p780_p2 = pnand %p1278_p11, %p1277_p9 }
 0x2c8   : > { %p781_p13 = pneg %p780_p2 }
 0x2ca   : > { %984 = dma.done.wait (%p781_p13), %s599_s28, 128  }
 0x2cb   : > { %986 = vsyncadd (%p781_p13), %s599_s28, 4294967168  ;;  %s23_s26 = sadd.s32 1, %s1009_s26   ;;  %s1279_s21 = smov %s993_s22 }
 0x2cc   : > { %p20_p0 = scmp.ge.s32.totalorder %s23_s26, 4   ;;  %s1280_s22 = smov %s997_s23 }
 0x2cd   : > { %s1281_s23 = smov %s1158_s17  ;;  %s1282_s24 = smov %s1005_s25 }
 0x2ce   : > { %s1283_s25 = smov %s1285_s10  ;;  %22 = sbr.rel (!%p20_p0) target bundleno = 10 (0xa), region = 97 }
 0x2d3   :  { %604 = vsyncpa [#allocation3], 1 }
 0x2d4   :  { %606 = vsyncpa [#allocation3 + $0x1], 1 }
 0x2d5   :  { %607 = vsyncpa [#allocation6], 1 }
 0x2d6   :  { %608 = vsyncpa [#allocation4], 1 }
 0x2d7   :  { %610 = vsyncpa [#allocation4 + $0x1], 1 }

</bundles_post_ra>
